<compile_context>
chip_gen: v7x
topology: tpu7x:2x2x1
jax: 0.10.0
libtpu: 0.0.40
codegen_flags: <defaults>
</compile_context>

<pallas_src>
import jax
import jax.numpy as jnp
from jax.experimental import pallas as pl
from jax.experimental.pallas import tpu as pltpu

HIDDEN_PAD = 128   # 50 -> 128 (one full lane-width vreg on the hidden axis)
OUT_PAD = 8        # N_ACTIONS -> 8 (one sublane tile; tiny output writeback)
TINY_BATCH = 64    # below this, a plain fused-XLA path beats a kernel launch
MAX_TB = 4096      # max batch-tile (lane) width per grid step


def _round_up(x, m):
    return ((x + m - 1) // m) * m


def net_kernel(x_ref, w1_ref, b1_ref, w2_ref, b2_ref, o_ref):
    # fc1: (128, K) @ (K, TB) + (128, 1)   -- K is tiny (e.g. 4)
    h = jnp.dot(w1_ref[...], x_ref[...], preferred_element_type=jnp.float32)
    h = jnp.maximum(h + b1_ref[...], 0.0)          # ReLU; padded rows stay 0
    # out: (8, 128) @ (128, TB) + (8, 1)
    y = jnp.dot(w2_ref[...], h, preferred_element_type=jnp.float32)
    o_ref[...] = (y + b2_ref[...]).astype(o_ref.dtype)


def prepare_params(w1, b1, w2, b2):
    """One-time prep: zero-pad PyTorch-layout weights for the lane=batch
    kernel layout.  No transposes needed (PyTorch stores (out, in), which is
    exactly the orientation for  y = W @ x_t).  Do this once and reuse."""
    hidden, n_states = w1.shape
    n_actions = w2.shape[0]
    dt = jnp.float32

    w1p = jnp.zeros((HIDDEN_PAD, n_states), dt).at[:hidden, :].set(w1)
    b1p = jnp.zeros((HIDDEN_PAD, 1), dt).at[:hidden, 0].set(b1)
    w2p = jnp.zeros((OUT_PAD, HIDDEN_PAD), dt).at[:n_actions, :hidden].set(w2)
    b2p = jnp.zeros((OUT_PAD, 1), dt).at[:n_actions, 0].set(b2)
    return (w1p, b1p, w2p, b2p, n_actions)


def _jnp_forward(x, w1p, b1p, w2p, b2p, n_actions):
    """Fused XLA path for tiny batches (no Pallas dispatch overhead)."""
    h = jnp.maximum(x @ w1p.T + b1p[:, 0], 0.0)
    y = h @ w2p.T + b2p[:, 0]
    return y[:, :n_actions]


def net_forward(x, params):
    """Forward pass matching the PyTorch Net.

    x      : (B, N_STATES) float32
    params : output of prepare_params()
    returns (B, N_ACTIONS) float32
    """
    w1p, b1p, w2p, b2p, n_actions = params
    B, n_states = x.shape

    if B <= TINY_BATCH:
        return _jnp_forward(x, w1p, b1p, w2p, b2p, n_actions)

    # Batch tile (lane dim): up to MAX_TB, multiple of 128, and capped at
    # ~half the (rounded) batch so the grid keeps >= 2 parallel steps and
    # both v7x TensorCores get work.  NOTE: tb depends on B, so each distinct
    # batch size compiles its own pallas_call variant (use fixed replay-batch
    # sizes at the call site to avoid recompiles).
    half = _round_up((B + 1) // 2, 128)
    tb = min(MAX_TB, max(128, half))
    b_pad = _round_up(B, tb)

    x_t = x.T                                   # (N_STATES, B): lane = batch
    if b_pad != B:                              # only pad ragged batches
        x_t = jnp.pad(x_t, ((0, 0), (0, b_pad - B)))

    out = pl.pallas_call(
        net_kernel,
        out_shape=jax.ShapeDtypeStruct((OUT_PAD, b_pad), x.dtype),
        grid_spec=pltpu.PrefetchScalarGridSpec(
            num_scalar_prefetch=0,
            grid=(b_pad // tb,),
            in_specs=[
                pl.BlockSpec((n_states, tb), lambda i: (0, i)),        # x streams
                pl.BlockSpec((HIDDEN_PAD, n_states), lambda i: (0, 0)),  # resident
                pl.BlockSpec((HIDDEN_PAD, 1), lambda i: (0, 0)),         # resident
                pl.BlockSpec((OUT_PAD, HIDDEN_PAD), lambda i: (0, 0)),   # resident
                pl.BlockSpec((OUT_PAD, 1), lambda i: (0, 0)),            # resident
            ],
            out_specs=pl.BlockSpec((OUT_PAD, tb), lambda i: (0, i)),
        ),
        compiler_params=pltpu.CompilerParams(
            dimension_semantics=("parallel",)),
    )(x_t, w1p, b1p, w2p, b2p)

    # Tiny (n_actions, B) slice + transpose back to batch-major.
    return out[:n_actions, :B].T


def init_params(key, n_states, n_actions, hidden=50):
    """Deterministic init mirroring the PyTorch module:
    weights ~ Normal(0, 0.1); biases use PyTorch's default Linear init
    (Uniform(-1/sqrt(fan_in), 1/sqrt(fan_in)))."""
    k1, k2, k3, k4 = jax.random.split(key, 4)
    w1 = 0.1 * jax.random.normal(k1, (hidden, n_states), dtype=jnp.float32)
    bound1 = 1.0 / jnp.sqrt(n_states)
    b1 = jax.random.uniform(k2, (hidden,), minval=-bound1, maxval=bound1,
                            dtype=jnp.float32)
    w2 = 0.1 * jax.random.normal(k3, (n_actions, hidden), dtype=jnp.float32)
    bound2 = 1.0 / jnp.sqrt(hidden)
    b2 = jax.random.uniform(k4, (n_actions,), minval=-bound2, maxval=bound2,
                            dtype=jnp.float32)
    return w1, b1, w2, b2


if __name__ == "__main__":
    key = jax.random.PRNGKey(0)
    N_STATES = 4      # e.g. CartPole observation dim
    N_ACTIONS = 2     # e.g. CartPole action dim

    kp, kx0, kx1, kx2 = jax.random.split(key, 4)
    w1, b1, w2, b2 = init_params(kp, N_STATES, N_ACTIONS)
    params = prepare_params(w1, b1, w2, b2)   # one-time prep, reused per call

    def ref_fn(x):
        return jnp.maximum(x @ w1.T + b1, 0.0) @ w2.T + b2

    # Tiny (action-selection) batch: exercises the fused-XLA fast path.
    x_small = jax.random.normal(kx0, (2, N_STATES), dtype=jnp.float32)
    out_small = jax.block_until_ready(net_forward(x_small, params))
    assert out_small.shape == (2, N_ACTIONS)
    assert jnp.allclose(out_small, ref_fn(x_small), atol=1e-5, rtol=1e-5)

    # Tile-aligned replay batch: Pallas path, grid of 2 parallel steps,
    # no padding copy.
    x_rep = jax.random.normal(kx1, (256, N_STATES), dtype=jnp.float32)
    out_rep = jax.block_until_ready(net_forward(x_rep, params))
    assert out_rep.shape == (256, N_ACTIONS)
    assert jnp.allclose(out_rep, ref_fn(x_rep), atol=1e-5, rtol=1e-5)

    # Ragged replay batch: Pallas path with batch padding + slice-off.
    x_rag = jax.random.normal(kx2, (300, N_STATES), dtype=jnp.float32)
    out_rag = jax.block_until_ready(net_forward(x_rag, params))
    assert out_rag.shape == (300, N_ACTIONS)
    assert jnp.allclose(out_rag, ref_fn(x_rag), atol=1e-5, rtol=1e-5)

    print("KERNEL_OK")
</pallas_src>

<mosaic_0001>
module attributes {stable_mosaic.version = 11 : i64} {
  func.func @net_kernel(%arg0: i32, %arg1: memref<4x128xf32, #tpu.memory_space<vmem>>, %arg2: memref<128x4xf32, #tpu.memory_space<vmem>>, %arg3: memref<128x1xf32, #tpu.memory_space<vmem>>, %arg4: memref<8x128xf32, #tpu.memory_space<vmem>>, %arg5: memref<8x1xf32, #tpu.memory_space<vmem>>, %arg6: memref<8x128xf32, #tpu.memory_space<vmem>>) attributes {dimension_semantics = [#tpu.dimension_semantics<parallel>], iteration_bounds = array<i64: 2>, scalar_prefetch = 0 : i64, scratch_operands = 0 : i64, tpu.core_type = #tpu.core_type<tc>, window_params = [{transform_indices = @transform_0, window_bounds = array<i64: 4, 128>}, {pipeline_mode = #tpu.pipeline_mode<synchronous>, transform_indices = @transform_1, window_bounds = array<i64: 128, 4>}, {pipeline_mode = #tpu.pipeline_mode<synchronous>, transform_indices = @transform_2, window_bounds = array<i64: 128, 1>}, {pipeline_mode = #tpu.pipeline_mode<synchronous>, transform_indices = @transform_3, window_bounds = array<i64: 8, 128>}, {pipeline_mode = #tpu.pipeline_mode<synchronous>, transform_indices = @transform_4, window_bounds = array<i64: 8, 1>}, {transform_indices = @transform_5, window_bounds = array<i64: 8, 128>}]} {
    %c0 = arith.constant 0 : index
    %c0_0 = arith.constant 0 : index
    %0 = vector.load %arg2[%c0, %c0_0] : memref<128x4xf32, #tpu.memory_space<vmem>>, vector<128x4xf32>
    %c0_1 = arith.constant 0 : index
    %c0_2 = arith.constant 0 : index
    %1 = vector.load %arg1[%c0_1, %c0_2] : memref<4x128xf32, #tpu.memory_space<vmem>>, vector<4x128xf32>
    %cst = arith.constant dense<0.000000e+00> : vector<128x128xf32>
    %2 = tpu.matmul %0, %1, %cst {dimension_numbers = #tpu.dot_dimension_numbers<[1], [0], [0], [1], [0, 0, 1, 1], [], []>} : vector<128x4xf32>, vector<4x128xf32>, vector<128x128xf32> -> vector<128x128xf32>
    %c0_3 = arith.constant 0 : index
    %c0_4 = arith.constant 0 : index
    %3 = vector.load %arg3[%c0_3, %c0_4] : memref<128x1xf32, #tpu.memory_space<vmem>>, vector<128x1xf32>
    %4 = vector.broadcast %3 : vector<128x1xf32> to vector<128x128xf32>
    %5 = arith.addf %2, %4 : vector<128x128xf32>
    %cst_5 = arith.constant 0.000000e+00 : f32
    %6 = vector.broadcast %cst_5 : f32 to vector<128x128xf32>
    %7 = arith.maximumf %5, %6 : vector<128x128xf32>
    %c0_6 = arith.constant 0 : index
    %c0_7 = arith.constant 0 : index
    %8 = vector.load %arg4[%c0_6, %c0_7] : memref<8x128xf32, #tpu.memory_space<vmem>>, vector<8x128xf32>
    %cst_8 = arith.constant dense<0.000000e+00> : vector<8x128xf32>
    %9 = tpu.matmul %8, %7, %cst_8 {dimension_numbers = #tpu.dot_dimension_numbers<[1], [0], [0], [1], [0, 0, 1, 1], [], []>} : vector<8x128xf32>, vector<128x128xf32>, vector<8x128xf32> -> vector<8x128xf32>
    %c0_9 = arith.constant 0 : index
    %c0_10 = arith.constant 0 : index
    %10 = vector.load %arg5[%c0_9, %c0_10] : memref<8x1xf32, #tpu.memory_space<vmem>>, vector<8x1xf32>
    %11 = vector.broadcast %10 : vector<8x1xf32> to vector<8x128xf32>
    %12 = arith.addf %9, %11 : vector<8x128xf32>
    %c0_11 = arith.constant 0 : index
    %c0_12 = arith.constant 0 : index
    %13 = vector.load %arg6[%c0_11, %c0_12] : memref<8x128xf32, #tpu.memory_space<vmem>>, vector<8x128xf32>
    tpu.vector_store %arg6[%c0_11, %c0_12], %12 {strides = array<i32>} : memref<8x128xf32, #tpu.memory_space<vmem>>, vector<8x128xf32>,
    return
  }
  func.func @transform_0(%arg0: i32) -> (i32, i32) {
    %c0_i32 = arith.constant 0 : i32
    %c0_i32_0 = arith.constant 0 : i32
    return %c0_i32, %arg0 : i32, i32
  }
  func.func @transform_1(%arg0: i32) -> (i32, i32) {
    %c0_i32 = arith.constant 0 : i32
    %c0_i32_0 = arith.constant 0 : i32
    %c0_i32_1 = arith.constant 0 : i32
    return %c0_i32, %c0_i32_0 : i32, i32
  }
  func.func @transform_2(%arg0: i32) -> (i32, i32) {
    %c0_i32 = arith.constant 0 : i32
    %c0_i32_0 = arith.constant 0 : i32
    %c0_i32_1 = arith.constant 0 : i32
    return %c0_i32, %c0_i32_0 : i32, i32
  }
  func.func @transform_3(%arg0: i32) -> (i32, i32) {
    %c0_i32 = arith.constant 0 : i32
    %c0_i32_0 = arith.constant 0 : i32
    %c0_i32_1 = arith.constant 0 : i32
    return %c0_i32, %c0_i32_0 : i32, i32
  }
  func.func @transform_4(%arg0: i32) -> (i32, i32) {
    %c0_i32 = arith.constant 0 : i32
    %c0_i32_0 = arith.constant 0 : i32
    %c0_i32_1 = arith.constant 0 : i32
    return %c0_i32, %c0_i32_0 : i32, i32
  }
  func.func @transform_5(%arg0: i32) -> (i32, i32) {
    %c0_i32 = arith.constant 0 : i32
    %c0_i32_0 = arith.constant 0 : i32
    return %c0_i32, %arg0 : i32, i32
  }
}

</mosaic_0001>

<bundles_post_ra>
// kernel: tpu_custom_call.1
= control target key start
LH: loop header
LB: loop body
LE: loop exit
PB: predicated region body
PF: predicated region fallthrough
CT: control target
= control target key end

     0   :  { %10 = vsyncpa [#allocation3], 0  ;;  %s1214_s0 = inlined_call_operand.vmem [shape: f32[4,256], index: 0, kind: input, shape index: {}]   ;;  %s1215_s1 = inlined_call_operand.vmem [shape: f32[128,4], index: 1, kind: input, shape index: {}]   ;;  %s1216_s2 = inlined_call_operand.vmem [shape: f32[128,1], index: 2, kind: input, shape index: {}]   ;;  %s1217_s3 = inlined_call_operand.vmem [shape: f32[8,128], index: 3, kind: input, shape index: {}]   ;;  %s1218_s4 = inlined_call_operand.vmem [shape: f32[8,1], index: 4, kind: input, shape index: {}]   ;;  %s1219_s5 = inlined_call_operand.hbm [shape: f32[8,256], index: 5, kind: output, shape index: {}]  }
   0x1   :  { %12 = vsyncpa [#allocation3 + $0x1], 0  ;;  %s988_s18 = smov 0   ;;  %s990_s19 = smov 0  }
   0x2   :  { %s992_s20 = smov 0   ;;  %s994_s21 = smov 0  }
   0x3 LB: > { %s1009_s22 = sadd.s32 4294967295, %s951_s21   ;;  %s698_s23 = sadd.s32 4294967294, %s951_s21   ;;  %s951_s21 = sphi %s994_s21, %s1225_s21   ;;  %s947_s20 = sphi %s992_s20, %s1224_s20   ;;  %s943_s19 = sphi %s990_s19, %s1223_s19   ;;  %s939_s18 = sphi %s988_s18, %s1222_s18  }
   0x4   : > { %s1013_s24 = sadd.s32 1, %s951_s21   ;;  %s135_s25 = sadd.s32 1, %s947_s20 }
   0x5   : > { %s132_s26 = ssub.s32 %s951_s21, %s1013_s24  ;;  %p145_p0 = scmp.ne.s32.totalorder %s947_s20, %s943_s19 }
   0x6   : > { %p133_p1 = scmp.eq.s32.totalorder %s132_s26, 0  ;;  %p146_p2 = scmp.eq.s32.totalorder %s1009_s22, 1 }
   0x7   : > { %p151_p3 = scmp.ne.s32.totalorder %s943_s19, %s939_s18  ;;  %p152_p4 = scmp.eq.s32.totalorder %s698_s23, 1 }
   0x8   : > { %s1024_s27 = scalar_select %p133_p1, %s947_s20, %s135_s25  }
   0x9   : > { %p1026_p5 = por %p146_p2, %p145_p0  ;;  %p1030_p6 = por %p152_p4, %p151_p3 }
   0xa   : > { %p701_p7 = scmp.ge.s32.totalorder %s951_s21, 1  ;;  %p189_p8 = scmp.lt.s32.totalorder %s951_s21, 3 }
   0xc   : > { %p190_p9 = pnand %p701_p7, %p189_p8 }
   0xd   : > { %p216_p10 = scmp.lt.s32.totalorder (!%p190_p9), %s1009_s22, 1  ;;  %v220_v0 = vld [vmem:[%s1215_s1] sm:$0xff] (!%p190_p9)  ;;  %vm333_vm0 = vcmask (!%p190_p9), 31744   ;;  %v953_v1 = vmov (!%p190_p9), 0   ;;  %vm382_vm1 = vcmask (!%p190_p9), 1043456   ;;  %v221_v4 = vld [vmem:[%s1215_s1 + $0x8] sm:$0xff] (!%p190_p9) }
   0xe   : > { %193 = sbr.rel (%p190_p9) target bundleno = 506 (0x1fa), region = 40  ;;  %761 = vmatprep.mubr.msk.f32.mxu0 (!%p190_p9), %vm333_vm0, %v220_v0  ;;  %887 = vset.pattern.permute.xlu0 (!%p190_p9), %v953_v1  ;;  %v237_v2 = vld [vmem:[%s1216_s2] sm:$0xff] (!%p190_p9)  ;;  %v239_v5 = vld [vmem:[%s1216_s2 + $0x10] sm:$0xff] (!%p190_p9)  ;;  %v238_v7 = vld [vmem:[%s1216_s2 + $0x8] sm:$0xff] (!%p190_p9)  ;;  %v954_v35 = vmov (!%p190_p9), 0.0|0.0   ;;  %vm955_vm2 = vmmov (!%p190_p9), 0  }
   0xf   : > { %888 = vset.pattern.permute.xlu1 (!%p190_p9), %v953_v1  ;;  %255 = vperm.xlu0 (!%p190_p9), %887, %v237_v2   ;;  %v222_v6 = vld [vmem:[%s1215_s1 + $0x10] sm:$0xff] (!%p190_p9)  ;;  %v240_v8 = vld [vmem:[%s1216_s2 + $0x18] sm:$0xff] (!%p190_p9)  ;;  %v224_v10 = vld [vmem:[%s1215_s1 + $0x20] sm:$0xff] (!%p190_p9)  ;;  %v956_v36 = vmov (!%p190_p9), 0.0   ;;  %s213_s14 = sand.u32 (!%p190_p9), 1, %s943_s19   ;;  %s722_s16 = sshll.u32 (!%p190_p9), %s1009_s22, 7 }
  0x10   : > { %265 = vperm.xlu1 (!%p190_p9), %888, %v239_v5   ;;  %v223_v9 = vld [vmem:[%s1215_s1 + $0x18] sm:$0xff] (!%p190_p9)  ;;  %v241_v11 = vld [vmem:[%s1216_s2 + $0x20] sm:$0xff] (!%p190_p9)  ;;  %v242_v12 = vld [vmem:[%s1216_s2 + $0x28] sm:$0xff] (!%p190_p9)  ;;  %820 = vmatprep.subr.bf16.mxu1 (!%p190_p9), %v954_v35  ;;  %s702_s15 = sshll.u32 (!%p190_p9), %s213_s14, 3  ;;  %s1172_s30 = scalar_lea.hbm (!%p190_p9), %s1219_s5, %s722_s16 }
  0x11   : > { %v225_v13 = vld [vmem:[%s1215_s1 + $0x28] sm:$0xff] (!%p190_p9)  ;;  %v226_v14 = vld [vmem:[%s1215_s1 + $0x30] sm:$0xff] (!%p190_p9)  ;;  %v244_v16 = vld [vmem:[%s1216_s2 + $0x38] sm:$0xff] (!%p190_p9)  ;;  %817 = vmatprep.mubr.msk.f32.mxu1 (!%p190_p9), %vm955_vm2, %v956_v36  ;;  %s215_s17 = scalar_lea.vmem (!%p190_p9), [#allocation2], %s702_s15  ;;  %s626_s6 = scalar_lea.sflag (!%p190_p9), [#allocation3], %s213_s14 }
  0x12   : > { %v243_v15 = vld [vmem:[%s1216_s2 + $0x30] sm:$0xff] (!%p190_p9)  ;;  %v227_v17 = vld [vmem:[%s1215_s1 + $0x38] sm:$0xff] (!%p190_p9)  ;;  %v228_v18 = vld [vmem:[%s1215_s1 + $0x40] sm:$0xff] (!%p190_p9)  ;;  %s639_s23 = sshll.u32 (!%p190_p9), %s215_s17, 4  ;;  %s1174_s23 = int_to_ptr.vmem [resolvable:$true] %s639_s23 }
  0x13   : > { %260 = vperm.xlu0 (!%p190_p9), %887, %v238_v7   ;;  %v245_v19 = vld [vmem:[%s1216_s2 + $0x40] sm:$0xff] (!%p190_p9)  ;;  %v246_v20 = vld [vmem:[%s1216_s2 + $0x48] sm:$0xff] (!%p190_p9)  ;;  %v230_v22 = vld [vmem:[%s1215_s1 + $0x50] sm:$0xff] (!%p190_p9) }
  0x14   : > { %270 = vperm.xlu1 (!%p190_p9), %888, %v240_v8   ;;  %v229_v21 = vld [vmem:[%s1215_s1 + $0x48] sm:$0xff] (!%p190_p9)  ;;  %v247_v23 = vld [vmem:[%s1216_s2 + $0x50] sm:$0xff] (!%p190_p9)  ;;  %v248_v24 = vld [vmem:[%s1216_s2 + $0x58] sm:$0xff] (!%p190_p9) }
  0x15   : > { %s217_s7 = scalar_select %p216_p10, %s1009_s22, 1  ;;  %v231_v25 = vld [vmem:[%s1215_s1 + $0x58] sm:$0xff]  ;;  %v232_v26 = vld [vmem:[%s1215_s1 + $0x60] sm:$0xff]  ;;  %v250_v28 = vld [vmem:[%s1216_s2 + $0x68] sm:$0xff] }
  0x16   : > { %v249_v27 = vld [vmem:[%s1216_s2 + $0x60] sm:$0xff]  ;;  %v233_v29 = vld [vmem:[%s1215_s1 + $0x68] sm:$0xff]  ;;  %v234_v30 = vld [vmem:[%s1215_s1 + $0x70] sm:$0xff]  ;;  %s957_s22 = smov [#allocation2]  }
  0x17   : > { %s703_s8 = sshll.u32 %s217_s7, 2  ;;  %275 = vperm.xlu0 %887, %v241_v11   ;;  %v251_v31 = vld [vmem:[%s1216_s2 + $0x70] sm:$0xff]  ;;  %v252_v32 = vld [vmem:[%s1216_s2 + $0x78] sm:$0xff]  ;;  %v548_v34 = vld [vmem:[%s1218_s4] sm:$0xff]  ;;  %s889_s7 = scalar_lea.vmem %s1174_s23, 128 }
  0x18   : > { %s219_s11 = scalar_lea.vmem %s1214_s0, %s703_s8  ;;  %280 = vperm.xlu1 %888, %v242_v12   ;;  %v235_v33 = vld [vmem:[%s1215_s1 + $0x78] sm:$0xff]  ;;  %p890_p11 = scmp.ne.s32.totalorder %s1174_s23, %s889_s7 }
  0x19   : > { %v236_v3 = vld [vmem:[%s219_s11] sm:$0xf]  ;;  %s893_s8 = sshll.u32 %s957_s22, 4  ;;  %s894_s8 = int_to_ptr.vmem [resolvable:$false] %s893_s8 }
  0x1a   : > { %759 = vmatprep.subr.msk.mxu0 %vm382_vm1, %v236_v3  ;;  %p891_p12 = pnand %p890_p11, %p1026_p5  ;;  %s895_s9 = scalar_lea.vmem %s894_s8, 256 }
  0x1b   : > { %760 = vmatpush3.msk.msra.mxu0 %vm382_vm1, %v236_v3  ;;  %285 = vperm.xlu0 %887, %v243_v15   ;;  %p896_p0 = scmp.lt.s32.totalorder %s1174_s23, %s894_s8  ;;  %p897_p1 = scmp.lt.s32.totalorder %s895_s9, %s889_s7 }
  0x1c   : > { %762 = vmatmul.mubr.msk.f32.vlgmr.msra.gmra.mrb[0].mxu0 %vm333_vm0, %v221_v4  ;;  %290 = vperm.xlu1 %888, %v244_v16   ;;  %p892_p13 = pneg %p891_p12 }
  0x1d   : > { %764 = vmatprep.mubr.msk.f32.mxu0 %vm333_vm0, %v222_v6  ;;  %p898_p2 = por %p897_p1, %p896_p0 }
  0x1f   : > { %295 = vperm.xlu0 %887, %v245_v19   ;;  %p899_p3 = pnand %p898_p2, %p892_p13 }
  0x20   : > { %765 = vmatmul.mubr.msk.f32.gmra.mrb[2].mxu0 %vm333_vm0, %v223_v9  ;;  %300 = vperm.xlu1 %888, %v246_v20  }
  0x21   : > { %767 = vmatprep.mubr.msk.f32.mxu0 %vm333_vm0, %v224_v10 }
  0x23   : > { %305 = vperm.xlu0 %887, %v247_v23  }
  0x24   : > { %768 = vmatmul.mubr.msk.f32.gmra.mrb[4].mxu0 %vm333_vm0, %v225_v13  ;;  %310 = vperm.xlu1 %888, %v248_v24  }
  0x25   : > { %770 = vmatprep.mubr.msk.f32.mxu0 %vm333_vm0, %v226_v14 }
  0x27   : > { %315 = vperm.xlu0 %887, %v249_v27  }
  0x28   : > { %771 = vmatmul.mubr.msk.f32.gmra.mrb[6].mxu0 %vm333_vm0, %v227_v17  ;;  %320 = vperm.xlu1 %888, %v250_v28  }
  0x29   : > { %773 = vmatprep.mubr.msk.f32.mxu0 %vm333_vm0, %v228_v18 }
  0x2b   : > { %325 = vperm.xlu0 %887, %v251_v31  }
  0x2c   : > { %774 = vmatmul.mubr.msk.f32.gmra.mrb[8].mxu0 %vm333_vm0, %v229_v21  ;;  %330 = vperm.xlu1 %888, %v252_v32  }
  0x2d   : > { %776 = vmatprep.mubr.msk.f32.mxu0 %vm333_vm0, %v230_v22 }
  0x2f   : > { %551 = vperm.xlu0 %887, %v548_v34  }
  0x30   : > { %777 = vmatmul.mubr.msk.f32.gmra.mrb[10].mxu0 %vm333_vm0, %v231_v25 }
  0x31   : > { %779 = vmatprep.mubr.msk.f32.mxu0 %vm333_vm0, %v232_v26 }
  0x34   : > { %780 = vmatmul.mubr.msk.f32.gmra.mrb[12].mxu0 %vm333_vm0, %v233_v29 }
  0x35   : > { %782 = vmatprep.mubr.msk.f32.mxu0 %vm333_vm0, %v234_v30 }
  0x38   : > { %783 = vmatmul.mubr.msk.f32.gmra.mrb[14].mxu0 %vm333_vm0, %v235_v33 }
  0x8e   : > { %v256_v38 = vpop.permute.xlu0 %255 }
  0x8f   : > { %v266_v37 = vpop.permute.xlu1 %265 }
  0x92   : > { %v261_v40 = vpop.permute.xlu0 %260 }
  0x93   : > { %v271_v39 = vpop.permute.xlu1 %270 }
  0x96   : > { %v276_v42 = vpop.permute.xlu0 %275 }
  0x97   : > { %v281_v41 = vpop.permute.xlu1 %280 }
  0x9a   : > { %v286_v51 = vpop.permute.xlu0 %285 }
  0x9b   : > { %v291_v48 = vpop.permute.xlu1 %290 }
  0x9e   : > { %v296_v0 = vpop.permute.xlu0 %295 }
  0x9f   : > { %v301_v61 = vpop.permute.xlu1 %300 }
  0xa2   : > { %v306_v12 = vpop.permute.xlu0 %305 }
  0xa3   : > { %v311_v9 = vpop.permute.xlu1 %310 }
  0xa6   : > { %v316_v25 = vpop.permute.xlu0 %315 }
  0xa7   : > { %v321_v22 = vpop.permute.xlu1 %320 }
  0xab   : > { %v331_v34 = vpop.permute.xlu1 %330 }
  0xef   : > { %v763_v43 = vpop.f32.mrb[0].mxu0 }
  0xf0   : > { %v458_v44 = vadd.f32 %v763_v43, %v261_v40  ;;  %v452_v45 = vpop.f32.mrb[1].mxu0 }
  0xf1   : > { %v453_v46 = vadd.f32 %v452_v45, %v256_v38  ;;  %v326_v38 = vpop.permute.xlu0 %325 }
  0xf2   : > { %v532_v47 = vmax.f32 %v458_v44, 0.0 }
  0xf3   : > { %v531_v49 = vmax.f32 %v453_v46, 0.0  ;;  %v766_v50 = vpop.f32.mrb[2].mxu0  ;;  %v547_v46 = vld [vmem:[%s1217_s3] sm:$0xff] }
  0xf4   : > { %v468_v52 = vadd.f32 %v766_v50, %v271_v39  ;;  %v462_v53 = vpop.f32.mrb[3].mxu0 }
  0xf5   : > { %v463_v54 = vadd.f32 %v462_v53, %v266_v37  ;;  %v821_v55 = vpack.c.bf16 %v532_v47, %v531_v49  ;;  %v552_v47 = vpop.permute.xlu0 %551 }
  0xf6   : > { %v534_v56 = vmax.f32 %v468_v52, 0.0 }
  0xf7   : > { %v533_v57 = vmax.f32 %v463_v54, 0.0  ;;  %v769_v58 = vpop.f32.mrb[4].mxu0  ;;  %822 = vmatpush3.bf16.msra.mxu1 %v821_v55 }
  0xf8   : > { %v478_v59 = vadd.f32 %v769_v58, %v281_v41  ;;  %v472_v60 = vpop.f32.mrb[5].mxu0  ;;  %823 = vmatprep.subr.bf16.mxu1 %v954_v35 }
  0xf9   : > { %v824_v62 = vpack.c.bf16 %v534_v56, %v533_v57  ;;  %v473_v63 = vadd.f32 %v472_v60, %v276_v42 }
  0xfa   : > { %v536_v1 = vmax.f32 %v478_v59, 0.0 }
  0xfb   : > { %v535_v2 = vmax.f32 %v473_v63, 0.0  ;;  %v772_v3 = vpop.f32.mrb[6].mxu0  ;;  %825 = vmatpush3.bf16.msra.mxu1 %v824_v62 }
  0xfc   : > { %v488_v4 = vadd.f32 %v772_v3, %v291_v48  ;;  %v482_v5 = vpop.f32.mrb[7].mxu0  ;;  %826 = vmatprep.subr.bf16.mxu1 %v954_v35 }
  0xfd   : > { %v827_v6 = vpack.c.bf16 %v536_v1, %v535_v2  ;;  %v483_v7 = vadd.f32 %v482_v5, %v286_v51 }
  0xfe   : > { %v538_v8 = vmax.f32 %v488_v4, 0.0 }
  0xff   : > { %v537_v10 = vmax.f32 %v483_v7, 0.0  ;;  %v775_v11 = vpop.f32.mrb[8].mxu0  ;;  %828 = vmatpush3.bf16.msra.mxu1 %v827_v6 }
 0x100   : > { %v498_v13 = vadd.f32 %v775_v11, %v301_v61  ;;  %v492_v14 = vpop.f32.mrb[9].mxu0  ;;  %829 = vmatprep.subr.bf16.mxu1 %v954_v35 }
 0x101   : > { %v830_v15 = vpack.c.bf16 %v538_v8, %v537_v10  ;;  %v493_v16 = vadd.f32 %v492_v14, %v296_v0 }
 0x102   : > { %v540_v17 = vmax.f32 %v498_v13, 0.0 }
 0x103   : > { %v539_v18 = vmax.f32 %v493_v16, 0.0  ;;  %v778_v19 = vpop.f32.mrb[10].mxu0  ;;  %831 = vmatpush3.bf16.msra.mxu1 %v830_v15 }
 0x104   : > { %v508_v20 = vadd.f32 %v778_v19, %v311_v9  ;;  %v502_v21 = vpop.f32.mrb[11].mxu0  ;;  %832 = vmatprep.subr.bf16.mxu1 %v954_v35 }
 0x105   : > { %v833_v23 = vpack.c.bf16 %v540_v17, %v539_v18  ;;  %v503_v24 = vadd.f32 %v502_v21, %v306_v12 }
 0x106   : > { %v542_v26 = vmax.f32 %v508_v20, 0.0 }
 0x107   : > { %v541_v27 = vmax.f32 %v503_v24, 0.0  ;;  %v781_v28 = vpop.f32.mrb[12].mxu0  ;;  %834 = vmatpush3.bf16.msra.mxu1 %v833_v23 }
 0x108   : > { %v518_v29 = vadd.f32 %v781_v28, %v321_v22  ;;  %v512_v30 = vpop.f32.mrb[13].mxu0  ;;  %835 = vmatprep.subr.bf16.mxu1 %v954_v35 }
 0x109   : > { %v836_v31 = vpack.c.bf16 %v542_v26, %v541_v27  ;;  %v513_v32 = vadd.f32 %v512_v30, %v316_v25 }
 0x10a   : > { %v544_v33 = vmax.f32 %v518_v29, 0.0 }
 0x10b   : > { %v543_v36 = vmax.f32 %v513_v32, 0.0  ;;  %v784_v37 = vpop.f32.mrb[14].mxu0  ;;  %837 = vmatpush3.bf16.msra.mxu1 %v836_v31 }
 0x10c   : > { %v528_v39 = vadd.f32 %v784_v37, %v331_v34  ;;  %v522_v40 = vpop.f32.mrb[15].mxu0  ;;  %838 = vmatprep.subr.bf16.mxu1 %v954_v35 }
 0x10d   : > { %v839_v41 = vpack.c.bf16 %v544_v33, %v543_v36  ;;  %v523_v42 = vadd.f32 %v522_v40, %v326_v38 }
 0x10e   : > { %v546_v43 = vmax.f32 %v528_v39, 0.0 }
 0x10f   : > { %v545_v44 = vmax.f32 %v523_v42, 0.0  ;;  %840 = vmatpush3.bf16.msra.mxu1 %v839_v41 }
 0x110   : > { %841 = vmatprep.subr.bf16.mxu1 %v954_v35 }
 0x111   : > { %v842_v45 = vpack.c.bf16 %v546_v43, %v545_v44 }
 0x113   : > { %843 = vmatpush3.bf16.msra.mxu1 %v842_v45 }
 0x116   : > { %818 = vmatmul.mubr.f32.vlgmr.msra.gmra.mrb[0].mxu1 %v547_v46 }
 0x1e9   : > { %v620_v48 = vpop.f32.mrb[0].mxu1 }
 0x1ea   : > { %v621_v49 = vadd.f32 %v620_v48, %v552_v47  ;;  %v819_v50 = vpop.f32.mrb[1].mxu1 }
 0x1ec   : > { %624 = vst [vmem:[%s215_s17] sm:$0xff] %v621_v49 }
 0x1ed   : > { %902 = shalt.err (!%p899_p3)
}
 0x1ee   : > { %s903_s10 = scalar_lea.hbm %s1172_s30, 128  ;;  %s907_s13 = scalar_lea.hbm %s1219_s5, 256 }
 0x1ef   : > { %p904_p4 = scmp.ne.s32.totalorder %s1172_s30, %s903_s10  ;;  %p908_p9 = scmp.lt.u32.totalorder %s1172_s30, %s1219_s5 }
 0x1f0   : > { %p909_p10 = scmp.lt.u32.totalorder %s907_s13, %s903_s10  ;;  %p911_p12 = scmp.lt.u32.totalorder %s903_s10, %s1172_s30 }
 0x1f1   : > { %p905_p7 = pnand %p904_p4, %p1026_p5 }
 0x1f2   : > { %p910_p11 = por %p909_p10, %p908_p9 }
 0x1f3   : > { %p906_p8 = pneg %p905_p7 }
 0x1f4   : > { %p912_p13 = por %p911_p12, %p910_p11 }
 0x1f6   : > { %p913_p0 = pnand %p912_p13, %p906_p8 }
 0x1f8   : > { %916 = shalt.err (!%p913_p0)
}
 0x1f9   : > { %844 = dma.vmem_to_hbm [thread:$0]  (%p1026_p5), %s1174_s23, 128, %s1172_s30, %s626_s6  }
 0x1fa PF: > { %p850_p1 = scmp.ge.s32.totalorder %s951_s21, 2  ;;  %s651_s16 = sand.u32 1, %s939_s18  }
 0x1fb   : > { %s652_s17 = scalar_lea.sflag [#allocation3], %s651_s16 }
 0x1fc   : > { %p847_p2 = pnand %p850_p1, %p1030_p6 }
 0x1fe   : > { %934 = dma.done.wait (!%p847_p2), %s652_s17, 128  }
 0x1ff   : > { %936 = vsyncadd (!%p847_p2), %s652_s17, 4294967168  ;;  %p15_p3 = scmp.ge.s32.totalorder %s1013_s24, 4   ;;  %s1222_s18 = smov %s943_s19 }
 0x200   : > { %s1223_s19 = smov %s947_s20  ;;  %s1224_s20 = smov %s1024_s27 }
 0x201   : > { %s1225_s21 = smov %s1013_s24  ;;  %17 = sbr.rel (!%p15_p3) target bundleno = 3 (0x3), region = 75 }
 0x208   :  { %657 = vsyncpa [#allocation3], 1 }
 0x209   :  { %659 = vsyncpa [#allocation3 + $0x1], 1 }

</bundles_post_ra>
